<compile_context>
chip_gen: v5e
topology: v5e:2x2
jax: 0.10.0
libtpu: 0.0.40
codegen_flags: <defaults>
</compile_context>

<pallas_src>
import functools

import jax
import jax.numpy as jnp
import numpy as np
from jax.experimental import pallas as pl
from jax.experimental.pallas import tpu as pltpu

_LANE = 128  # output lane padding width


def _lstm_fc_kernel(x_ref,
                    w0_ref, b0_ref,
                    w1_ref, b1_ref,
                    w2_ref, b2_ref,
                    wfc_ref, bfc_ref,
                    out_ref):
    """Single-step 3-layer LSTM (zero initial state) + final Linear.

    x_ref:  (TILE_B, F) activation tile
    wN_ref: (in, 4H) pre-transposed input weights, bN_ref: (1, 4H) fused biases
    wfc_ref:(H, 128) lane-padded FC weights, bfc_ref: (1, 128)
    out_ref:(TILE_B, 128) lane-dense output tile
    """
    def cell(x, w_ih_t, b):
        # x: (TILE_B, in), w_ih_t: (in, 4H), b: (1, 4H)
        gates = jnp.dot(x, w_ih_t, preferred_element_type=jnp.float32) + b
        h_dim = w_ih_t.shape[1] // 4
        # Single (in, 4H) matmul; 4H-aligned lane slices at 0/H/2H/3H are cheap
        # XLU work.  f-gate is dead (c_prev = 0) and is DCE'd by the tracer.
        i = jax.nn.sigmoid(gates[:, 0:h_dim])
        g = jnp.tanh(gates[:, 2 * h_dim:3 * h_dim])
        o = jax.nn.sigmoid(gates[:, 3 * h_dim:4 * h_dim])
        c = i * g                 # c_prev = 0
        return o * jnp.tanh(c)

    h = cell(x_ref[...], w0_ref[...], b0_ref[...])
    h = cell(h, w1_ref[...], b1_ref[...])
    h = cell(h, w2_ref[...], b2_ref[...])

    out = jnp.dot(h, wfc_ref[...], preferred_element_type=jnp.float32) + bfc_ref[...]
    out_ref[...] = out.astype(out_ref.dtype)


def prepare_params(params):
    """One-time parameter preparation (do this at load time, NOT per call).

    - transpose weights to (in, out) row-major layout for the MXU
    - fuse b_ih + b_hh per layer
    - zero-pad the FC weight/bias columns to 128 lanes (lane-dense output)
    Returns (prepared_tuple, output_size).
    """
    (w_ih0, b_ih0, b_hh0,
     w_ih1, b_ih1, b_hh1,
     w_ih2, b_ih2, b_hh2,
     w_fc, b_fc) = params

    out_size, hidden = w_fc.shape
    pad_o = max(_LANE, ((out_size + _LANE - 1) // _LANE) * _LANE)

    w0_t = jnp.transpose(w_ih0).astype(jnp.float32)              # (F, 4H)
    w1_t = jnp.transpose(w_ih1).astype(jnp.float32)              # (H, 4H)
    w2_t = jnp.transpose(w_ih2).astype(jnp.float32)              # (H, 4H)
    b0 = (b_ih0 + b_hh0).reshape(1, -1).astype(jnp.float32)
    b1 = (b_ih1 + b_hh1).reshape(1, -1).astype(jnp.float32)
    b2 = (b_ih2 + b_hh2).reshape(1, -1).astype(jnp.float32)

    wfc_t = jnp.zeros((hidden, pad_o), jnp.float32).at[:, :out_size].set(
        jnp.transpose(w_fc).astype(jnp.float32))                 # (H, 128)
    bfc = jnp.zeros((1, pad_o), jnp.float32).at[0, :out_size].set(
        b_fc.astype(jnp.float32))                                # (1, 128)

    prepared = tuple(jax.device_put(a) for a in
                     (w0_t, b0, w1_t, b1, w2_t, b2, wfc_t, bfc))
    return prepared, out_size


@functools.partial(jax.jit, static_argnames=("out_size",))
def _forward(x, w0_t, b0, w1_t, b1, w2_t, b2, wfc_t, bfc, *, out_size):
    B, F = x.shape
    H = w1_t.shape[0]
    pad_o = wfc_t.shape[1]

    # Batch tile: multiple of 8 sublanes; 256 rows for large batches
    # (matches v6e/v7x 256-wide MXU; also a multiple of 128 for v5e).
    tile_b = 256 if B >= 256 else ((B + 7) // 8) * 8
    b_pad = ((B + tile_b - 1) // tile_b) * tile_b
    if b_pad != B:
        x = jnp.pad(x, ((0, b_pad - B), (0, 0)))
    grid = (b_pad // tile_b,)

    flops = 2 * b_pad * (F * 4 * H + 2 * H * 4 * H + H * pad_o)
    transcendentals = 3 * 5 * b_pad * H  # 3 layers x (3 sigmoid + 2 tanh) per unit
    bytes_accessed = 4 * (x.size + w0_t.size + b0.size + w1_t.size + b1.size
                          + w2_t.size + b2.size + wfc_t.size + bfc.size
                          + b_pad * pad_o)

    const = lambda i: (0, 0)   # weights resident across all batch tiles
    out_padded = pl.pallas_call(
        _lstm_fc_kernel,
        out_shape=jax.ShapeDtypeStruct((b_pad, pad_o), jnp.float32),
        grid=grid,
        in_specs=[
            pl.BlockSpec((tile_b, F), lambda i: (i, 0)),   # x, tiled over batch
            pl.BlockSpec(w0_t.shape, const),
            pl.BlockSpec(b0.shape, const),
            pl.BlockSpec(w1_t.shape, const),
            pl.BlockSpec(b1.shape, const),
            pl.BlockSpec(w2_t.shape, const),
            pl.BlockSpec(b2.shape, const),
            pl.BlockSpec(wfc_t.shape, const),
            pl.BlockSpec(bfc.shape, const),
        ],
        out_specs=pl.BlockSpec((tile_b, pad_o), lambda i: (i, 0)),
        compiler_params=pltpu.CompilerParams(
            dimension_semantics=("parallel",)),
        cost_estimate=pl.CostEstimate(
            flops=flops,
            transcendentals=transcendentals,
            bytes_accessed=bytes_accessed),
    )(x, w0_t, b0, w1_t, b1, w2_t, b2, wfc_t, bfc)

    return out_padded[:B, :out_size]


def electricity_usage_predictor(x, prepared, out_size):
    """Forward pass: x is (B, F); seq dim of length 1 is implicit (unsqueeze(1))."""
    return _forward(x, *prepared, out_size=out_size)


def _reference(x, params):
    """Pure-JAX reference of the same forward pass (for correctness check)."""
    (w_ih0, b_ih0, b_hh0,
     w_ih1, b_ih1, b_hh1,
     w_ih2, b_ih2, b_hh2,
     w_fc, b_fc) = params

    def cell(x, w_ih, b_ih, b_hh):
        gates = x @ w_ih.T + b_ih + b_hh
        h_dim = w_ih.shape[0] // 4
        i = jax.nn.sigmoid(gates[:, 0:h_dim])
        g = jnp.tanh(gates[:, 2 * h_dim:3 * h_dim])
        o = jax.nn.sigmoid(gates[:, 3 * h_dim:4 * h_dim])
        c = i * g
        return o * jnp.tanh(c)

    h = cell(x, w_ih0, b_ih0, b_hh0)
    h = cell(h, w_ih1, b_ih1, b_hh1)
    h = cell(h, w_ih2, b_ih2, b_hh2)
    return h @ w_fc.T + b_fc


def _init_params(key, feature_size, hidden_size, output_size):
    """Deterministic synthetic parameters (shapes match nn.LSTM / nn.Linear)."""
    ks = jax.random.split(key, 11)
    s = 0.1
    w_ih0 = jax.random.normal(ks[0], (4 * hidden_size, feature_size), jnp.float32) * s
    b_ih0 = jax.random.normal(ks[1], (4 * hidden_size,), jnp.float32) * s
    b_hh0 = jax.random.normal(ks[2], (4 * hidden_size,), jnp.float32) * s
    w_ih1 = jax.random.normal(ks[3], (4 * hidden_size, hidden_size), jnp.float32) * s
    b_ih1 = jax.random.normal(ks[4], (4 * hidden_size,), jnp.float32) * s
    b_hh1 = jax.random.normal(ks[5], (4 * hidden_size,), jnp.float32) * s
    w_ih2 = jax.random.normal(ks[6], (4 * hidden_size, hidden_size), jnp.float32) * s
    b_ih2 = jax.random.normal(ks[7], (4 * hidden_size,), jnp.float32) * s
    b_hh2 = jax.random.normal(ks[8], (4 * hidden_size,), jnp.float32) * s
    w_fc = jax.random.normal(ks[9], (output_size, hidden_size), jnp.float32) * s
    b_fc = jax.random.normal(ks[10], (output_size,), jnp.float32) * s
    return (w_ih0, b_ih0, b_hh0,
            w_ih1, b_ih1, b_hh1,
            w_ih2, b_ih2, b_hh2,
            w_fc, b_fc)


if __name__ == "__main__":
    # Small shapes consistent with the module's forward (module defaults:
    # hidden_size=128, num_layers=3, output_size=12); x is (batch, feature_size)
    # and the seq dim of length 1 is added by unsqueeze(1) inside the model.
    batch = 2
    feature_size = 8
    hidden_size = 128
    output_size = 12

    key = jax.random.PRNGKey(0)
    k_x, k_p = jax.random.split(key)
    x = jax.random.uniform(k_x, (batch, feature_size), jnp.float32)  # MinMax-scaled-like [0,1)
    params = _init_params(k_p, feature_size, hidden_size, output_size)

    # One-time parameter preparation (transpose / fuse bias / lane-pad FC).
    prepared, out_size = prepare_params(params)

    out = electricity_usage_predictor(x, prepared, out_size)
    out = jax.block_until_ready(out)

    ref = _reference(x, params)
    assert out.shape == (batch, output_size)
    assert np.allclose(np.asarray(out), np.asarray(ref), atol=1e-5, rtol=1e-5)

    print("KERNEL_OK")
</pallas_src>

<mosaic_0001>
module attributes {stable_mosaic.version = 11 : i64} {
  func.func @_lstm_fc_kernel(%arg0: i32, %arg1: memref<8x8xf32, #tpu.memory_space<vmem>>, %arg2: memref<8x512xf32, #tpu.memory_space<vmem>>, %arg3: memref<1x512xf32, #tpu.memory_space<vmem>>, %arg4: memref<128x512xf32, #tpu.memory_space<vmem>>, %arg5: memref<1x512xf32, #tpu.memory_space<vmem>>, %arg6: memref<128x512xf32, #tpu.memory_space<vmem>>, %arg7: memref<1x512xf32, #tpu.memory_space<vmem>>, %arg8: memref<128x128xf32, #tpu.memory_space<vmem>>, %arg9: memref<1x128xf32, #tpu.memory_space<vmem>>, %arg10: memref<8x128xf32, #tpu.memory_space<vmem>>) attributes {dimension_semantics = [#tpu.dimension_semantics<parallel>], iteration_bounds = array<i64: 1>, scalar_prefetch = 0 : i64, scratch_operands = 0 : i64, tpu.core_type = #tpu.core_type<tc>, window_params = [{transform_indices = @transform_0, window_bounds = array<i64: 8, 8>}, {pipeline_mode = #tpu.pipeline_mode<synchronous>, transform_indices = @transform_1, window_bounds = array<i64: 8, 512>}, {pipeline_mode = #tpu.pipeline_mode<synchronous>, transform_indices = @transform_2, window_bounds = array<i64: 1, 512>}, {pipeline_mode = #tpu.pipeline_mode<synchronous>, transform_indices = @transform_3, window_bounds = array<i64: 128, 512>}, {pipeline_mode = #tpu.pipeline_mode<synchronous>, transform_indices = @transform_4, window_bounds = array<i64: 1, 512>}, {pipeline_mode = #tpu.pipeline_mode<synchronous>, transform_indices = @transform_5, window_bounds = array<i64: 128, 512>}, {pipeline_mode = #tpu.pipeline_mode<synchronous>, transform_indices = @transform_6, window_bounds = array<i64: 1, 512>}, {pipeline_mode = #tpu.pipeline_mode<synchronous>, transform_indices = @transform_7, window_bounds = array<i64: 128, 128>}, {pipeline_mode = #tpu.pipeline_mode<synchronous>, transform_indices = @transform_8, window_bounds = array<i64: 1, 128>}, {transform_indices = @transform_9, window_bounds = array<i64: 8, 128>}]} {
    %c0 = arith.constant 0 : index
    %c0_0 = arith.constant 0 : index
    %0 = vector.load %arg1[%c0, %c0_0] : memref<8x8xf32, #tpu.memory_space<vmem>>, vector<8x8xf32>
    %c0_1 = arith.constant 0 : index
    %c0_2 = arith.constant 0 : index
    %1 = vector.load %arg2[%c0_1, %c0_2] : memref<8x512xf32, #tpu.memory_space<vmem>>, vector<8x512xf32>
    %c0_3 = arith.constant 0 : index
    %c0_4 = arith.constant 0 : index
    %2 = vector.load %arg3[%c0_3, %c0_4] : memref<1x512xf32, #tpu.memory_space<vmem>>, vector<1x512xf32>
    %cst = arith.constant dense<0.000000e+00> : vector<8x512xf32>
    %3 = tpu.matmul %0, %1, %cst {dimension_numbers = #tpu.dot_dimension_numbers<[1], [0], [0], [1], [0, 0, 1, 1], [], []>} : vector<8x8xf32>, vector<8x512xf32>, vector<8x512xf32> -> vector<8x512xf32>
    %4 = vector.broadcast %2 : vector<1x512xf32> to vector<8x512xf32>
    %5 = arith.addf %3, %4 : vector<8x512xf32>
    %6 = vector.extract_strided_slice %5 {offsets = [0, 0], sizes = [8, 128], strides = [1, 1]} : vector<8x512xf32> to vector<8x128xf32>
    %7 = arith.negf %6 : vector<8x128xf32>
    %8 = math.exp %7 : vector<8x128xf32>
    %cst_5 = arith.constant 1.000000e+00 : f32
    %9 = vector.broadcast %cst_5 : f32 to vector<8x128xf32>
    %10 = arith.addf %9, %8 : vector<8x128xf32>
    %11 = arith.divf %9, %10 : vector<8x128xf32>
    %12 = vector.extract_strided_slice %5 {offsets = [0, 256], sizes = [8, 128], strides = [1, 1]} : vector<8x512xf32> to vector<8x128xf32>
    %13 = math.tanh %12 : vector<8x128xf32>
    %14 = vector.extract_strided_slice %5 {offsets = [0, 384], sizes = [8, 128], strides = [1, 1]} : vector<8x512xf32> to vector<8x128xf32>
    %15 = arith.negf %14 : vector<8x128xf32>
    %16 = math.exp %15 : vector<8x128xf32>
    %cst_6 = arith.constant 1.000000e+00 : f32
    %17 = vector.broadcast %cst_6 : f32 to vector<8x128xf32>
    %18 = arith.addf %17, %16 : vector<8x128xf32>
    %19 = arith.divf %17, %18 : vector<8x128xf32>
    %20 = arith.mulf %11, %13 : vector<8x128xf32>
    %21 = math.tanh %20 : vector<8x128xf32>
    %22 = arith.mulf %19, %21 : vector<8x128xf32>
    %c0_7 = arith.constant 0 : index
    %c0_8 = arith.constant 0 : index
    %23 = vector.load %arg4[%c0_7, %c0_8] : memref<128x512xf32, #tpu.memory_space<vmem>>, vector<128x512xf32>
    %c0_9 = arith.constant 0 : index
    %c0_10 = arith.constant 0 : index
    %24 = vector.load %arg5[%c0_9, %c0_10] : memref<1x512xf32, #tpu.memory_space<vmem>>, vector<1x512xf32>
    %cst_11 = arith.constant dense<0.000000e+00> : vector<8x512xf32>
    %25 = tpu.matmul %22, %23, %cst_11 {dimension_numbers = #tpu.dot_dimension_numbers<[1], [0], [0], [1], [0, 0, 1, 1], [], []>} : vector<8x128xf32>, vector<128x512xf32>, vector<8x512xf32> -> vector<8x512xf32>
    %26 = vector.broadcast %24 : vector<1x512xf32> to vector<8x512xf32>
    %27 = arith.addf %25, %26 : vector<8x512xf32>
    %28 = vector.extract_strided_slice %27 {offsets = [0, 0], sizes = [8, 128], strides = [1, 1]} : vector<8x512xf32> to vector<8x128xf32>
    %29 = arith.negf %28 : vector<8x128xf32>
    %30 = math.exp %29 : vector<8x128xf32>
    %cst_12 = arith.constant 1.000000e+00 : f32
    %31 = vector.broadcast %cst_12 : f32 to vector<8x128xf32>
    %32 = arith.addf %31, %30 : vector<8x128xf32>
    %33 = arith.divf %31, %32 : vector<8x128xf32>
    %34 = vector.extract_strided_slice %27 {offsets = [0, 256], sizes = [8, 128], strides = [1, 1]} : vector<8x512xf32> to vector<8x128xf32>
    %35 = math.tanh %34 : vector<8x128xf32>
    %36 = vector.extract_strided_slice %27 {offsets = [0, 384], sizes = [8, 128], strides = [1, 1]} : vector<8x512xf32> to vector<8x128xf32>
    %37 = arith.negf %36 : vector<8x128xf32>
    %38 = math.exp %37 : vector<8x128xf32>
    %cst_13 = arith.constant 1.000000e+00 : f32
    %39 = vector.broadcast %cst_13 : f32 to vector<8x128xf32>
    %40 = arith.addf %39, %38 : vector<8x128xf32>
    %41 = arith.divf %39, %40 : vector<8x128xf32>
    %42 = arith.mulf %33, %35 : vector<8x128xf32>
    %43 = math.tanh %42 : vector<8x128xf32>
    %44 = arith.mulf %41, %43 : vector<8x128xf32>
    %c0_14 = arith.constant 0 : index
    %c0_15 = arith.constant 0 : index
    %45 = vector.load %arg6[%c0_14, %c0_15] : memref<128x512xf32, #tpu.memory_space<vmem>>, vector<128x512xf32>
    %c0_16 = arith.constant 0 : index
    %c0_17 = arith.constant 0 : index
    %46 = vector.load %arg7[%c0_16, %c0_17] : memref<1x512xf32, #tpu.memory_space<vmem>>, vector<1x512xf32>
    %cst_18 = arith.constant dense<0.000000e+00> : vector<8x512xf32>
    %47 = tpu.matmul %44, %45, %cst_18 {dimension_numbers = #tpu.dot_dimension_numbers<[1], [0], [0], [1], [0, 0, 1, 1], [], []>} : vector<8x128xf32>, vector<128x512xf32>, vector<8x512xf32> -> vector<8x512xf32>
    %48 = vector.broadcast %46 : vector<1x512xf32> to vector<8x512xf32>
    %49 = arith.addf %47, %48 : vector<8x512xf32>
    %50 = vector.extract_strided_slice %49 {offsets = [0, 0], sizes = [8, 128], strides = [1, 1]} : vector<8x512xf32> to vector<8x128xf32>
    %51 = arith.negf %50 : vector<8x128xf32>
    %52 = math.exp %51 : vector<8x128xf32>
    %cst_19 = arith.constant 1.000000e+00 : f32
    %53 = vector.broadcast %cst_19 : f32 to vector<8x128xf32>
    %54 = arith.addf %53, %52 : vector<8x128xf32>
    %55 = arith.divf %53, %54 : vector<8x128xf32>
    %56 = vector.extract_strided_slice %49 {offsets = [0, 256], sizes = [8, 128], strides = [1, 1]} : vector<8x512xf32> to vector<8x128xf32>
    %57 = math.tanh %56 : vector<8x128xf32>
    %58 = vector.extract_strided_slice %49 {offsets = [0, 384], sizes = [8, 128], strides = [1, 1]} : vector<8x512xf32> to vector<8x128xf32>
    %59 = arith.negf %58 : vector<8x128xf32>
    %60 = math.exp %59 : vector<8x128xf32>
    %cst_20 = arith.constant 1.000000e+00 : f32
    %61 = vector.broadcast %cst_20 : f32 to vector<8x128xf32>
    %62 = arith.addf %61, %60 : vector<8x128xf32>
    %63 = arith.divf %61, %62 : vector<8x128xf32>
    %64 = arith.mulf %55, %57 : vector<8x128xf32>
    %65 = math.tanh %64 : vector<8x128xf32>
    %66 = arith.mulf %63, %65 : vector<8x128xf32>
    %c0_21 = arith.constant 0 : index
    %c0_22 = arith.constant 0 : index
    %67 = vector.load %arg8[%c0_21, %c0_22] : memref<128x128xf32, #tpu.memory_space<vmem>>, vector<128x128xf32>
    %cst_23 = arith.constant dense<0.000000e+00> : vector<8x128xf32>
    %68 = tpu.matmul %66, %67, %cst_23 {dimension_numbers = #tpu.dot_dimension_numbers<[1], [0], [0], [1], [0, 0, 1, 1], [], []>} : vector<8x128xf32>, vector<128x128xf32>, vector<8x128xf32> -> vector<8x128xf32>
    %c0_24 = arith.constant 0 : index
    %c0_25 = arith.constant 0 : index
    %69 = vector.load %arg9[%c0_24, %c0_25] : memref<1x128xf32, #tpu.memory_space<vmem>>, vector<1x128xf32>
    %70 = vector.broadcast %69 : vector<1x128xf32> to vector<8x128xf32>
    %71 = arith.addf %68, %70 : vector<8x128xf32>
    %c0_26 = arith.constant 0 : index
    %c0_27 = arith.constant 0 : index
    %72 = vector.load %arg10[%c0_26, %c0_27] : memref<8x128xf32, #tpu.memory_space<vmem>>, vector<8x128xf32>
    tpu.vector_store %arg10[%c0_26, %c0_27], %71 {strides = array<i32>} : memref<8x128xf32, #tpu.memory_space<vmem>>, vector<8x128xf32>,
    return
  }
  func.func @transform_0(%arg0: i32) -> (i32, i32) {
    %c0_i32 = arith.constant 0 : i32
    %c0_i32_0 = arith.constant 0 : i32
    return %arg0, %c0_i32 : i32, i32
  }
  func.func @transform_1(%arg0: i32) -> (i32, i32) {
    %c0_i32 = arith.constant 0 : i32
    %c0_i32_0 = arith.constant 0 : i32
    %c0_i32_1 = arith.constant 0 : i32
    return %c0_i32, %c0_i32_0 : i32, i32
  }
  func.func @transform_2(%arg0: i32) -> (i32, i32) {
    %c0_i32 = arith.constant 0 : i32
    %c0_i32_0 = arith.constant 0 : i32
    %c0_i32_1 = arith.constant 0 : i32
    return %c0_i32, %c0_i32_0 : i32, i32
  }
  func.func @transform_3(%arg0: i32) -> (i32, i32) {
    %c0_i32 = arith.constant 0 : i32
    %c0_i32_0 = arith.constant 0 : i32
    %c0_i32_1 = arith.constant 0 : i32
    return %c0_i32, %c0_i32_0 : i32, i32
  }
  func.func @transform_4(%arg0: i32) -> (i32, i32) {
    %c0_i32 = arith.constant 0 : i32
    %c0_i32_0 = arith.constant 0 : i32
    %c0_i32_1 = arith.constant 0 : i32
    return %c0_i32, %c0_i32_0 : i32, i32
  }
  func.func @transform_5(%arg0: i32) -> (i32, i32) {
    %c0_i32 = arith.constant 0 : i32
    %c0_i32_0 = arith.constant 0 : i32
    %c0_i32_1 = arith.constant 0 : i32
    return %c0_i32, %c0_i32_0 : i32, i32
  }
  func.func @transform_6(%arg0: i32) -> (i32, i32) {
    %c0_i32 = arith.constant 0 : i32
    %c0_i32_0 = arith.constant 0 : i32
    %c0_i32_1 = arith.constant 0 : i32
    return %c0_i32, %c0_i32_0 : i32, i32
  }
  func.func @transform_7(%arg0: i32) -> (i32, i32) {
    %c0_i32 = arith.constant 0 : i32
    %c0_i32_0 = arith.constant 0 : i32
    %c0_i32_1 = arith.constant 0 : i32
    return %c0_i32, %c0_i32_0 : i32, i32
  }
  func.func @transform_8(%arg0: i32) -> (i32, i32) {
    %c0_i32 = arith.constant 0 : i32
    %c0_i32_0 = arith.constant 0 : i32
    %c0_i32_1 = arith.constant 0 : i32
    return %c0_i32, %c0_i32_0 : i32, i32
  }
  func.func @transform_9(%arg0: i32) -> (i32, i32) {
    %c0_i32 = arith.constant 0 : i32
    %c0_i32_0 = arith.constant 0 : i32
    return %arg0, %c0_i32 : i32, i32
  }
}

</mosaic_0001>

<bundles_post_ra>
// kernel: _forward.1
= control target key start
LH: loop header
LB: loop body
LE: loop exit
PB: predicated region body
PF: predicated region fallthrough
CT: control target
= control target key end

     0   :  { %14 = vsyncpa [#allocation3], 0  ;;  %s829_s0 = inlined_call_operand.vmem [shape: f32[8,8], index: 0, kind: input, shape index: {}]   ;;  %s830_s1 = inlined_call_operand.hbm [shape: f32[8,512], index: 1, kind: input, shape index: {}]   ;;  %s831_s2 = inlined_call_operand.vmem [shape: f32[1,512], index: 2, kind: input, shape index: {}]   ;;  %s832_s3 = inlined_call_operand.hbm [shape: f32[128,512], index: 3, kind: input, shape index: {}]   ;;  %s833_s4 = inlined_call_operand.vmem [shape: f32[1,512], index: 4, kind: input, shape index: {}]   ;;  %s834_s5 = inlined_call_operand.hbm [shape: f32[128,512], index: 5, kind: input, shape index: {}]   ;;  %s835_s6 = inlined_call_operand.vmem [shape: f32[1,512], index: 6, kind: input, shape index: {}]   ;;  %s836_s7 = inlined_call_operand.hbm [shape: f32[128,128], index: 7, kind: input, shape index: {}]   ;;  %s837_s8 = inlined_call_operand.vmem [shape: f32[1,128], index: 8, kind: input, shape index: {}]   ;;  %s838_s9 = inlined_call_operand.vmem [shape: f32[8,128], index: 9, kind: output, shape index: {}]  }
   0x1   :  { %15 = vsyncpa [#allocation5], 0  ;;  %s36_s11 = sshll.u32 %s832_s3, 4  ;;  %s37_s11 = int_to_ptr.hbm [resolvable:$true] %s36_s11 }
   0x2   :  { %16 = vsyncpa [#allocation8], 0  ;;  %s731_s12 = smov [#allocation4]   ;;  %s24_s16 = sshll.u32 %s830_s1, 4  ;;  %s25_s16 = int_to_ptr.hbm [resolvable:$true] %s24_s16 }
   0x3   :  { %s38_s13 = sshll.u32 %s731_s12, 4  ;;  %s732_s17 = smov 512   ;;  %s39_s13 = int_to_ptr.vmem [resolvable:$true] %s38_s13 }
   0x4   :  { %s733_s18 = smov 32   ;;  %s734_s19 = smov [#allocation2]  }
   0x5   :  { %44 = dma.hbm_to_vmem [thread:$0]  %s37_s11, 8192, %s39_s13, [#allocation5], %s732_s17, %s732_s17, %s733_s18  }
   0x6   :  { %s26_s20 = sshll.u32 %s734_s19, 4  ;;  %s51_s23 = sshll.u32 %s834_s5, 4  ;;  %s27_s20 = int_to_ptr.vmem [resolvable:$true] %s26_s20  ;;  %s52_s23 = int_to_ptr.hbm [resolvable:$true] %s51_s23 }
   0x7   :  { %29 = dma.hbm_to_vmem [thread:$0]  %s25_s16, 512, %s27_s20, [#allocation3]  }
   0x8   :  { %s66_s25 = sshll.u32 %s836_s7, 4  ;;  %s735_s26 = smov [#allocation6]   ;;  %s67_s25 = int_to_ptr.hbm [resolvable:$true] %s66_s25 }
   0x9   :  { %s53_s27 = sshll.u32 %s735_s26, 4  ;;  %s736_s1 = smov [#allocation7]   ;;  %s54_s27 = int_to_ptr.vmem [resolvable:$true] %s53_s27 }
   0xa   :  { %59 = dma.hbm_to_vmem [thread:$0]  %s52_s23, 8192, %s54_s27, [#allocation5], %s732_s17, %s732_s17, %s733_s18  }
   0xb   :  { %s68_s28 = sshll.u32 %s736_s1, 4  ;;  %s737_s29 = smov 128   ;;  %s69_s28 = int_to_ptr.vmem [resolvable:$true] %s68_s28 }
   0xc   :  { %s738_s30 = smov 8  }
   0xd   :  { %74 = dma.hbm_to_vmem [thread:$0]  %s67_s25, 2048, %s69_s28, [#allocation8], %s737_s29, %s737_s29, %s738_s30  }
   0xe   :  { %725 = dma.done.wait [#allocation3], 512  }
   0xf   :  { %726 = vsyncadd [#allocation3], 4294966784 }
  0x10   :  { %727 = dma.done.wait [#allocation5], 16384  }
  0x11   :  { %728 = vsyncadd [#allocation5], 4294950912 }
  0x12   :  { %729 = dma.done.wait [#allocation8], 2048  }
  0x13   :  { %730 = vsyncadd [#allocation8], 4294965248  ;;  %vm105_vm0 = vcmask 64512   ;;  %v94_v0 = vld [vmem:[#allocation2] sm:$0xff]  ;;  %v95_v2 = vld [vmem:[#allocation2 + $0x10] sm:$0xff] }
  0x14   :  { %v93_v1 = vld [vmem:[%s829_s0] sm:$0xff]  ;;  %124 = vmatpush.msra.mxu2 %v94_v0  ;;  %v96_v3 = vld [vmem:[#allocation2 + $0x18] sm:$0xff]  ;;  %v257_v5 = vld [vmem:[#allocation4 + $0x1f0] sm:$0xff] }
  0x15   :  { %575 = vmatmul.msk.f32.vlgmr.msra.gmra.mxu2 %vm105_vm0, %v93_v1  ;;  %v256_v4 = vld [vmem:[#allocation4 + $0x1e0] sm:$0xff]  ;;  %v258_v6 = vld [vmem:[#allocation4 + $0x1f8] sm:$0xff]  ;;  %287 = vmatpush.msra.mxu0 %v257_v5  ;;  %v254_v8 = vld [vmem:[#allocation4 + $0x1d0] sm:$0xff] }
  0x16   :  { %144 = vmatpush.msrb.mxu2 %v95_v2  ;;  %267 = vmatpush.msra.mxu3 %v256_v4  ;;  %v253_v7 = vld [vmem:[#allocation4 + $0x1c0] sm:$0xff]  ;;  %v255_v9 = vld [vmem:[#allocation4 + $0x1d8] sm:$0xff]  ;;  %v251_v11 = vld [vmem:[#allocation4 + $0x1b0] sm:$0xff] }
  0x17   :  { %307 = vmatpush.msra.mxu1 %v258_v6  ;;  %288 = vmatpush.msra.mxu0 %v254_v8  ;;  %v250_v10 = vld [vmem:[#allocation4 + $0x1a0] sm:$0xff]  ;;  %v252_v12 = vld [vmem:[#allocation4 + $0x1b8] sm:$0xff]  ;;  %v248_v14 = vld [vmem:[#allocation4 + $0x190] sm:$0xff] }
  0x18   :  { %164 = vmatpush.msra.mxu2 %v96_v3  ;;  %268 = vmatpush.msra.mxu3 %v253_v7  ;;  %v247_v13 = vld [vmem:[#allocation4 + $0x180] sm:$0xff]  ;;  %v249_v15 = vld [vmem:[#allocation4 + $0x198] sm:$0xff]  ;;  %v245_v17 = vld [vmem:[#allocation4 + $0x170] sm:$0xff] }
  0x19   :  { %308 = vmatpush.msra.mxu1 %v255_v9  ;;  %289 = vmatpush.msra.mxu0 %v251_v11  ;;  %v244_v16 = vld [vmem:[#allocation4 + $0x160] sm:$0xff]  ;;  %v246_v18 = vld [vmem:[#allocation4 + $0x178] sm:$0xff]  ;;  %v242_v21 = vld [vmem:[#allocation4 + $0x150] sm:$0xff] }
  0x1a   :  { %269 = vmatpush.msra.mxu3 %v250_v10  ;;  %v807_v19 = vld [vmem:[%s831_s2] sm:$0xf]  ;;  %v243_v22 = vld [vmem:[#allocation4 + $0x158] sm:$0xff]  ;;  %v239_v25 = vld [vmem:[#allocation4 + $0x130] sm:$0xff] }
  0x1b   :  { %309 = vmatpush.msra.mxu1 %v252_v12  ;;  %290 = vmatpush.msra.mxu0 %v248_v14  ;;  %v241_v20 = vld [vmem:[#allocation4 + $0x140] sm:$0xff]  ;;  %v99_v23 = vperm.slane %v807_v19, 0  ;;  %v240_v26 = vld [vmem:[#allocation4 + $0x138] sm:$0xff]  ;;  %v236_v28 = vld [vmem:[#allocation4 + $0x110] sm:$0xff]  ;;  %v101_v57 = vperm.slane %v807_v19, 3  ;;  %v100_v2 = vperm.slane %v807_v19, 2 }
  0x1c   :  { %270 = vmatpush.msra.mxu3 %v247_v13  ;;  %v238_v24 = vld [vmem:[#allocation4 + $0x120] sm:$0xff]  ;;  %v237_v29 = vld [vmem:[#allocation4 + $0x118] sm:$0xff]  ;;  %v233_v33 = vld [vmem:[#allocation4 + $0xf0] sm:$0xff] }
  0x1d   :  { %576 = vmatmul.msk.f32.vlgmr.msrb.gmra.mxu2 %vm105_vm0, %v93_v1  ;;  %310 = vmatpush.msra.mxu1 %v249_v15  ;;  %v235_v27 = vld [vmem:[#allocation4 + $0x100] sm:$0xff]  ;;  %v234_v34 = vld [vmem:[#allocation4 + $0xf8] sm:$0xff]  ;;  %v230_v37 = vld [vmem:[#allocation4 + $0xd0] sm:$0xff] }
  0x1e   :  { %271 = vmatpush.msra.mxu3 %v244_v16  ;;  %291 = vmatpush.msra.mxu0 %v245_v17  ;;  %v232_v32 = vld [vmem:[#allocation4 + $0xe0] sm:$0xff]  ;;  %v231_v38 = vld [vmem:[#allocation4 + $0xd8] sm:$0xff]  ;;  %v227_v40 = vld [vmem:[#allocation4 + $0xb0] sm:$0xff] }
  0x1f   :  { %311 = vmatpush.msra.mxu1 %v246_v18  ;;  %v229_v36 = vld [vmem:[#allocation4 + $0xc0] sm:$0xff]  ;;  %v228_v41 = vld [vmem:[#allocation4 + $0xb8] sm:$0xff]  ;;  %v224_v43 = vld [vmem:[#allocation4 + $0x90] sm:$0xff] }
  0x20   :  { %272 = vmatpush.msra.mxu3 %v241_v20  ;;  %292 = vmatpush.msra.mxu0 %v242_v21  ;;  %v226_v39 = vld [vmem:[#allocation4 + $0xa0] sm:$0xff]  ;;  %v225_v44 = vld [vmem:[#allocation4 + $0x98] sm:$0xff]  ;;  %v221_v46 = vld [vmem:[#allocation4 + $0x70] sm:$0xff] }
  0x21   :  { %312 = vmatpush.msra.mxu1 %v243_v22  ;;  %v223_v42 = vld [vmem:[#allocation4 + $0x80] sm:$0xff]  ;;  %v222_v48 = vld [vmem:[#allocation4 + $0x78] sm:$0xff]  ;;  %v218_v50 = vld [vmem:[#allocation4 + $0x50] sm:$0xff] }
  0x22   :  { %273 = vmatpush.msra.mxu3 %v238_v24  ;;  %293 = vmatpush.msra.mxu0 %v239_v25  ;;  %v220_v45 = vld [vmem:[#allocation4 + $0x60] sm:$0xff]  ;;  %v219_v51 = vld [vmem:[#allocation4 + $0x58] sm:$0xff]  ;;  %v215_v54 = vld [vmem:[#allocation4 + $0x30] sm:$0xff] }
  0x23   :  { %313 = vmatpush.msra.mxu1 %v240_v26  ;;  %v217_v49 = vld [vmem:[#allocation4 + $0x40] sm:$0xff]  ;;  %v216_v56 = vld [vmem:[#allocation4 + $0x38] sm:$0xff]  ;;  %v212_v59 = vld [vmem:[#allocation4 + $0x10] sm:$0xff] }
  0x24   :  { %274 = vmatpush.msra.mxu3 %v235_v27  ;;  %294 = vmatpush.msra.mxu0 %v236_v28  ;;  %v214_v53 = vld [vmem:[#allocation4 + $0x20] sm:$0xff]  ;;  %v213_v60 = vld [vmem:[#allocation4 + $0x18] sm:$0xff] }
  0x25   :  { %577 = vmatmul.msk.f32.vlgmr.msra.gmra.mxu2 %vm105_vm0, %v93_v1  ;;  %314 = vmatpush.msra.mxu1 %v237_v29  ;;  %v211_v58 = vld [vmem:[#allocation4] sm:$0xff]  ;;  %v415_v29 = vld [vmem:[#allocation6 + $0x1f0] sm:$0xff] }
  0x26   :  { %275 = vmatpush.msra.mxu3 %v232_v32  ;;  %295 = vmatpush.msra.mxu0 %v233_v33  ;;  %v414_v28 = vld [vmem:[#allocation6 + $0x1e0] sm:$0xff]  ;;  %v412_v32 = vld [vmem:[#allocation6 + $0x1d0] sm:$0xff]  ;;  %v413_v33 = vld [vmem:[#allocation6 + $0x1d8] sm:$0xff] }
  0x27   :  { %315 = vmatpush.msra.mxu1 %v234_v34  ;;  %425 = vmatpush.msrb.mxu2 %v414_v28  ;;  %v408_v34 = vld [vmem:[#allocation6 + $0x1a0] sm:$0xff] }
  0x28   :  { %276 = vmatpush.msra.mxu3 %v229_v36  ;;  %296 = vmatpush.msra.mxu0 %v230_v37  ;;  %v410_v36 = vld [vmem:[#allocation6 + $0x1b8] sm:$0xff]  ;;  %v405_v37 = vld [vmem:[#allocation6 + $0x180] sm:$0xff] }
  0x29   :  { %316 = vmatpush.msra.mxu1 %v231_v38  ;;  %v406_v38 = vld [vmem:[#allocation6 + $0x190] sm:$0xff] }
  0x2a   :  { %277 = vmatpush.msra.mxu3 %v226_v39  ;;  %297 = vmatpush.msra.mxu0 %v227_v40  ;;  %v407_v39 = vld [vmem:[#allocation6 + $0x198] sm:$0xff]  ;;  %v402_v40 = vld [vmem:[#allocation6 + $0x160] sm:$0xff] }
  0x2b   :  { %317 = vmatpush.msra.mxu1 %v228_v41  ;;  %v403_v41 = vld [vmem:[#allocation6 + $0x170] sm:$0xff] }
  0x2c   :  { %278 = vmatpush.msra.mxu3 %v223_v42  ;;  %298 = vmatpush.msra.mxu0 %v224_v43  ;;  %v404_v42 = vld [vmem:[#allocation6 + $0x178] sm:$0xff]  ;;  %v815_v43 = vld [vmem:[%s833_s4] sm:$0xf] }
  0x2d   :  { %318 = vmatpush.msra.mxu1 %v225_v44  ;;  %v399_v44 = vld [vmem:[#allocation6 + $0x140] sm:$0xff] }
  0x2e   :  { %279 = vmatpush.msra.mxu3 %v220_v45  ;;  %299 = vmatpush.msra.mxu0 %v221_v46  ;;  %v400_v45 = vld [vmem:[#allocation6 + $0x150] sm:$0xff]  ;;  %v401_v46 = vld [vmem:[#allocation6 + $0x158] sm:$0xff] }
  0x2f   :  { %319 = vmatpush.msra.mxu1 %v222_v48  ;;  %v397_v48 = vld [vmem:[#allocation6 + $0x130] sm:$0xff] }
  0x30   :  { %280 = vmatpush.msra.mxu3 %v217_v49  ;;  %300 = vmatpush.msra.mxu0 %v218_v50  ;;  %v398_v49 = vld [vmem:[#allocation6 + $0x138] sm:$0xff]  ;;  %v263_v50 = vperm.slane %v815_v43, 3 }
  0x31   :  { %320 = vmatpush.msra.mxu1 %v219_v51  ;;  %v393_v51 = vld [vmem:[#allocation6 + $0x100] sm:$0xff] }
  0x32   :  { %281 = vmatpush.msra.mxu3 %v214_v53  ;;  %301 = vmatpush.msra.mxu0 %v215_v54  ;;  %v395_v53 = vld [vmem:[#allocation6 + $0x118] sm:$0xff] }
  0x33   :  { %321 = vmatpush.msra.mxu1 %v216_v56  ;;  %v391_v56 = vld [vmem:[#allocation6 + $0xf0] sm:$0xff] }
  0x34   :  { %282 = vmatpush.msra.mxu3 %v211_v58  ;;  %302 = vmatpush.msra.mxu0 %v212_v59  ;;  %v387_v59 = vld [vmem:[#allocation6 + $0xc0] sm:$0xff] }
  0x35   :  { %322 = vmatpush.msra.mxu1 %v213_v60  ;;  %v388_v60 = vld [vmem:[#allocation6 + $0xd0] sm:$0xff] }
  0x36   :  { %445 = vmatpush.msrb.mxu3 %v415_v29 }
  0x38   :  { %446 = vmatpush.msrb.mxu3 %v412_v32 }
  0x98   :  { %v126_v30 = vpop.f32.mrf.mxu2 }
  0x99   :  { %v127_v31 = vadd.f32 %v126_v30, %v99_v23  ;;  %v416_v30 = vld [vmem:[#allocation6 + $0x1f8] sm:$0xff] }
  0x9a   :  { %465 = vmatpush.msrb.mxu0 %v416_v30 }
  0x9b   :  { %v578_v35 = vmul.f32 -1.442695, %v127_v31  ;;  %v411_v31 = vld [vmem:[#allocation6 + $0x1c0] sm:$0xff] }
  0x9c   :  { %426 = vmatpush.msrb.mxu2 %v411_v31  ;;  %466 = vmatpush.msrb.mxu0 %v413_v33 }
  0x9d   :  { %593 = vpow2.f32 %v578_v35  ;;  %v409_v35 = vld [vmem:[#allocation6 + $0x1b0] sm:$0xff] }
  0x9e   :  { %427 = vmatpush.msrb.mxu2 %v408_v34  ;;  %447 = vmatpush.msrb.mxu3 %v409_v35 }
  0x9f   :  { %467 = vmatpush.msrb.mxu0 %v410_v36 }
  0xa0   :  { %v146_v47 = vpop.f32.mrf.mxu2  ;;  %428 = vmatpush.msrb.mxu2 %v405_v37  ;;  %448 = vmatpush.msrb.mxu3 %v406_v38 }
  0xa1   :  { %v147_v4 = vadd.f32 %v146_v47, %v100_v2  ;;  %468 = vmatpush.msrb.mxu0 %v407_v39  ;;  %v396_v47 = vld [vmem:[#allocation6 + $0x120] sm:$0xff]  ;;  %v386_v2 = vld [vmem:[#allocation6 + $0xb8] sm:$0xff] }
  0xa2   :  { %429 = vmatpush.msrb.mxu2 %v402_v40  ;;  %449 = vmatpush.msrb.mxu3 %v403_v41 }
  0xa3   :  { %v594_v52 = vpop.eup %593  ;;  %469 = vmatpush.msrb.mxu0 %v404_v42 }
  0xa4   :  { %v172_v55 = vadd.f32 1.0, %v594_v52  ;;  %430 = vmatpush.msrb.mxu2 %v399_v44  ;;  %450 = vmatpush.msrb.mxu3 %v400_v45  ;;  %v394_v52 = vld [vmem:[#allocation6 + $0x110] sm:$0xff] }
  0xa5   :  { %470 = vmatpush.msrb.mxu0 %v401_v46 }
  0xa6   :  { %595 = vrcp.f32 %v172_v55  ;;  %v184_v8 = vand.u32 2147483648, %v172_v55  ;;  %vm178_vm2 = vweird.f32 %v172_v55  ;;  %v182_v9 = vand.u32 2147483647, %v172_v55  ;;  %431 = vmatpush.msrb.mxu2 %v396_v47  ;;  %451 = vmatpush.msrb.mxu3 %v397_v48 }
  0xa7   :  { %471 = vmatpush.msrb.mxu0 %v398_v49 }
  0xa8   :  { %v166_v61 = vpop.f32.mrf.mxu2  ;;  %v185_v12 = vor.u32 1.1754944e-38, %v184_v8  ;;  %vm183_vm4 = vcmp.eq.f32.partialorder %v182_v9, 8.507059e+37  ;;  %432 = vmatpush.msrb.mxu2 %v393_v51  ;;  %452 = vmatpush.msrb.mxu3 %v394_v52  ;;  %v378_v8 = vld [vmem:[#allocation6 + $0x60] sm:$0xff]  ;;  %v379_v9 = vld [vmem:[#allocation6 + $0x70] sm:$0xff]  ;;  %v542_v52 = vld [vmem:[#allocation7 + $0x78] sm:$0xff] }
  0xa9   :  { %v167_v62 = vadd.f32 %v166_v61, %v101_v57  ;;  %472 = vmatpush.msrb.mxu0 %v395_v53  ;;  %v392_v57 = vld [vmem:[#allocation6 + $0xf8] sm:$0xff]  ;;  %547 = vmatpush.msrb.mxu1 %v542_v52  ;;  %v541_v53 = vld [vmem:[#allocation7 + $0x70] sm:$0xff] }
  0xaa   :  { %453 = vmatpush.msrb.mxu3 %v391_v56  ;;  %v389_v61 = vld [vmem:[#allocation6 + $0xd8] sm:$0xff] }
  0xab   :  { %v579_v63 = vmul.f32 -1.442695, %v167_v62  ;;  %v261_v62 = vperm.slane %v815_v43, 0  ;;  %473 = vmatpush.msrb.mxu0 %v392_v57  ;;  %548 = vmatpush.msrb.mxu1 %v541_v53  ;;  %v538_v56 = vld [vmem:[#allocation7 + $0x58] sm:$0xff]  ;;  %v417_v57 = vld [vmem:[%s835_s6] sm:$0xf] }
  0xac   :  { %v596_v0 = vpop.eup %595  ;;  %454 = vmatpush.msrb.mxu3 %v388_v60  ;;  %v421_v60 = vperm.slane %v417_v57, 3 }
  0xad   :  { %v174_v1 = vmul.f32 %v596_v0, %v172_v55  ;;  %597 = vpow2.f32 %v579_v63  ;;  %vm179_vm1 = vweird.f32 %v596_v0  ;;  %v390_v55 = vld [vmem:[#allocation6 + $0xe0] sm:$0xff]  ;;  %474 = vmatpush.msrb.mxu0 %v389_v61 }
  0xae   :  { %vm180_vm3 = vmor %vm178_vm2, %vm179_vm1  ;;  %599 = vtanh.f32 %v147_v4  ;;  %433 = vmatpush.msrb.mxu2 %v390_v55  ;;  %v384_v63 = vld [vmem:[#allocation6 + $0xa0] sm:$0xff]  ;;  %v382_v4 = vld [vmem:[#allocation6 + $0x90] sm:$0xff] }
  0xaf   :  { %v175_v3 = vsub.f32 1.0, %v174_v1  ;;  %475 = vmatpush.msrb.mxu0 %v386_v2  ;;  %v539_v55 = vld [vmem:[#allocation7 + $0x60] sm:$0xff]  ;;  %v533_v2 = vld [vmem:[#allocation7 + $0x30] sm:$0xff] }
  0xb0   :  { %434 = vmatpush.msrb.mxu2 %v387_v59  ;;  %v536_v59 = vld [vmem:[#allocation7 + $0x48] sm:$0xff]  ;;  %v535_v61 = vld [vmem:[#allocation7 + $0x40] sm:$0xff] }
  0xb1   :  { %v176_v5 = vmul.f32 %v596_v0, %v175_v3  ;;  %v381_v3 = vld [vmem:[#allocation6 + $0x80] sm:$0xff] }
  0xb2   :  { %435 = vmatpush.msrb.mxu2 %v384_v63  ;;  %v534_v63 = vld [vmem:[#allocation7 + $0x38] sm:$0xff] }
  0xb3   :  { %v598_v6 = vpop.eup %597  ;;  %v177_v7 = vadd.f32 %v596_v0, %v176_v5 }
  0xb4   :  { %v192_v10 = vadd.f32 1.0, %v598_v6  ;;  %v600_v14 = vpop.eup %599  ;;  %v383_v6 = vld [vmem:[#allocation6 + $0x98] sm:$0xff]  ;;  %436 = vmatpush.msrb.mxu2 %v381_v3 }
  0xb5   :  { %v181_v11 = vsel %vm180_vm3, %v596_v0, %v177_v7  ;;  %v385_v0 = vld [vmem:[#allocation6 + $0xb0] sm:$0xff]  ;;  %476 = vmatpush.msrb.mxu0 %v383_v6 }
  0xb6   :  { %601 = vrcp.f32 %v192_v10  ;;  %v186_v13 = vsel %vm183_vm4, %v185_v12, %v181_v11  ;;  %v204_v19 = vand.u32 2147483648, %v192_v10  ;;  %v202_v21 = vand.u32 2147483647, %v192_v10  ;;  %455 = vmatpush.msrb.mxu3 %v385_v0  ;;  %v375_v12 = vld [vmem:[#allocation6 + $0x40] sm:$0xff]  ;;  %437 = vmatpush.msrb.mxu2 %v378_v8  ;;  %v530_v8 = vld [vmem:[#allocation7 + $0x18] sm:$0xff] }
  0xb7   :  { %v208_v16 = vmul.f32 %v600_v14, %v186_v13  ;;  %vm198_vm6 = vweird.f32 %v192_v10  ;;  %v376_v13 = vld [vmem:[#allocation6 + $0x50] sm:$0xff]  ;;  %v377_v14 = vld [vmem:[#allocation6 + $0x58] sm:$0xff] }
  0xb8   :  { %v205_v23 = vor.u32 1.1754944e-38, %v204_v19  ;;  %vm203_vm8 = vcmp.eq.f32.partialorder %v202_v21, 8.507059e+37  ;;  %456 = vmatpush.msrb.mxu3 %v382_v4  ;;  %438 = vmatpush.msrb.mxu2 %v375_v12  ;;  %v370_v21 = vld [vmem:[#allocation6 + $0x10] sm:$0xff]  ;;  %v532_v4 = vld [vmem:[#allocation7 + $0x28] sm:$0xff] }
  0xb9   :  { %603 = vtanh.f32 %v208_v16  ;;  %v373_v16 = vld [vmem:[#allocation6 + $0x30] sm:$0xff] }
  0xba   :  { %457 = vmatpush.msrb.mxu3 %v379_v9 }
  0xbc   :  { %v602_v15 = vpop.eup %601  ;;  %458 = vmatpush.msrb.mxu3 %v376_v13 }
  0xbd   :  { %v194_v17 = vmul.f32 %v602_v15, %v192_v10  ;;  %vm199_vm5 = vweird.f32 %v602_v15  ;;  %v380_v10 = vld [vmem:[#allocation6 + $0x78] sm:$0xff] }
  0xbe   :  { %vm200_vm7 = vmor %vm198_vm6, %vm199_vm5  ;;  %477 = vmatpush.msrb.mxu0 %v380_v10  ;;  %459 = vmatpush.msrb.mxu3 %v373_v16  ;;  %v529_v10 = vld [vmem:[#allocation7 + $0x10] sm:$0xff] }
  0xbf   :  { %v195_v18 = vsub.f32 1.0, %v194_v17  ;;  %v604_v25 = vpop.eup %603 }
  0xc0   :  { %478 = vmatpush.msrb.mxu0 %v377_v14  ;;  %460 = vmatpush.msrb.mxu3 %v370_v21  ;;  %v527_v14 = vld [vmem:[#allocation7] sm:$0xff] }
  0xc1   :  { %v196_v20 = vmul.f32 %v602_v15, %v195_v18  ;;  %v374_v18 = vld [vmem:[#allocation6 + $0x38] sm:$0xff] }
  0xc2   :  { %479 = vmatpush.msrb.mxu0 %v374_v18 }
  0xc3   :  { %v197_v22 = vadd.f32 %v602_v15, %v196_v20  ;;  %v369_v20 = vld [vmem:[#allocation6] sm:$0xff] }
  0xc5   :  { %v201_v24 = vsel %vm200_vm7, %v602_v15, %v197_v22  ;;  %v372_v15 = vld [vmem:[#allocation6 + $0x20] sm:$0xff]  ;;  %v371_v22 = vld [vmem:[#allocation6 + $0x18] sm:$0xff] }
  0xc6   :  { %v206_v26 = vsel %vm203_vm8, %v205_v23, %v201_v24  ;;  %439 = vmatpush.msrb.mxu2 %v372_v15  ;;  %480 = vmatpush.msrb.mxu0 %v371_v22 }
  0xc7   :  { %v210_v27 = vmul.f32 %v604_v25, %v206_v26  ;;  %v262_v25 = vperm.slane %v815_v43, 2 }
  0xc8   :  { %440 = vmatpush.msrb.mxu2 %v369_v20 }
  0xc9   :  { %283 = vmatmul.f32.vlgmr.msra.gmra.mxu3 %v210_v27  ;;  %303 = vmatmul.f32.vlgmr.msra.gmra.mxu0 %v210_v27 }
  0xca   :  { %323 = vmatmul.f32.vlgmr.msra.gmra.mxu1 %v210_v27 }
 0x146   :  { %v304_v27 = vpop.f32.mrf.mxu0 }
 0x147   :  { %v324_v54 = vpop.f32.mrf.mxu1  ;;  %v305_v29 = vadd.f32 %v304_v27, %v262_v25 }
 0x148   :  { %v325_v58 = vadd.f32 %v324_v54, %v263_v50  ;;  %v540_v54 = vld [vmem:[#allocation7 + $0x68] sm:$0xff] }
 0x149   :  { %549 = vmatpush.msrb.mxu1 %v540_v54 }
 0x14a   :  { %v581_v1 = vmul.f32 -1.442695, %v325_v58  ;;  %v537_v58 = vld [vmem:[#allocation7 + $0x50] sm:$0xff] }
 0x14b   :  { %550 = vmatpush.msrb.mxu1 %v539_v55 }
 0x14c   :  { %605 = vpow2.f32 %v581_v1  ;;  %v284_v5 = vpop.f32.mrf.mxu3  ;;  %v419_v1 = vperm.slane %v417_v57, 0 }
 0x14d   :  { %v285_v7 = vadd.f32 %v284_v5, %v261_v62  ;;  %551 = vmatpush.msrb.mxu1 %v538_v56 }
 0x14f   :  { %v580_v11 = vmul.f32 -1.442695, %v285_v7  ;;  %552 = vmatpush.msrb.mxu1 %v537_v58  ;;  %v531_v7 = vld [vmem:[#allocation7 + $0x20] sm:$0xff] }
 0x151   :  { %607 = vpow2.f32 %v580_v11  ;;  %553 = vmatpush.msrb.mxu1 %v536_v59  ;;  %v528_v11 = vld [vmem:[#allocation7 + $0x8] sm:$0xff] }
 0x152   :  { %v606_v17 = vpop.eup %605 }
 0x153   :  { %v350_v19 = vadd.f32 1.0, %v606_v17  ;;  %554 = vmatpush.msrb.mxu1 %v535_v61  ;;  %v420_v17 = vperm.slane %v417_v57, 2 }
 0x155   :  { %609 = vrcp.f32 %v350_v19  ;;  %v362_v45 = vand.u32 2147483648, %v350_v19  ;;  %vm356_vm14 = vweird.f32 %v350_v19  ;;  %v360_v46 = vand.u32 2147483647, %v350_v19  ;;  %555 = vmatpush.msrb.mxu1 %v534_v63 }
 0x157   :  { %v608_v23 = vpop.eup %607  ;;  %v363_v48 = vor.u32 1.1754944e-38, %v362_v45  ;;  %vm361_vm0 = vcmp.eq.f32.partialorder %v360_v46, 8.507059e+37  ;;  %556 = vmatpush.msrb.mxu1 %v533_v2 }
 0x158   :  { %v330_v24 = vadd.f32 1.0, %v608_v23 }
 0x159   :  { %557 = vmatpush.msrb.mxu1 %v532_v4 }
 0x15a   :  { %611 = vrcp.f32 %v330_v24  ;;  %v342_v34 = vand.u32 2147483648, %v330_v24  ;;  %v340_v36 = vand.u32 2147483647, %v330_v24  ;;  %vm336_vm10 = vweird.f32 %v330_v24 }
 0x15b   :  { %v610_v26 = vpop.eup %609  ;;  %613 = vtanh.f32 %v305_v29  ;;  %558 = vmatpush.msrb.mxu1 %v531_v7 }
 0x15c   :  { %v352_v30 = vmul.f32 %v610_v26, %v350_v19  ;;  %v343_v38 = vor.u32 1.1754944e-38, %v342_v34  ;;  %vm341_vm12 = vcmp.eq.f32.partialorder %v340_v36, 8.507059e+37  ;;  %vm357_vm13 = vweird.f32 %v610_v26 }
 0x15d   :  { %vm358_vm15 = vmor %vm356_vm14, %vm357_vm13  ;;  %559 = vmatpush.msrb.mxu1 %v530_v8 }
 0x15e   :  { %v353_v33 = vsub.f32 1.0, %v352_v30 }
 0x15f   :  { %560 = vmatpush.msrb.mxu1 %v529_v10 }
 0x160   :  { %v612_v28 = vpop.eup %611  ;;  %v354_v39 = vmul.f32 %v610_v26, %v353_v33 }
 0x161   :  { %v332_v31 = vmul.f32 %v612_v28, %v330_v24  ;;  %vm337_vm9 = vweird.f32 %v612_v28  ;;  %v614_v41 = vpop.eup %613  ;;  %561 = vmatpush.msrb.mxu1 %v528_v11 }
 0x162   :  { %vm338_vm11 = vmor %vm336_vm10, %vm337_vm9  ;;  %v355_v44 = vadd.f32 %v610_v26, %v354_v39 }
 0x163   :  { %v333_v32 = vsub.f32 1.0, %v332_v31  ;;  %562 = vmatpush.msrb.mxu1 %v527_v14 }
 0x164   :  { %v359_v47 = vsel %vm358_vm15, %v610_v26, %v355_v44  ;;  %v592_v44 = vld [vmem:[%s837_s8] ss:$0 sm:$0xff] }
 0x165   :  { %v334_v35 = vmul.f32 %v612_v28, %v333_v32  ;;  %v364_v50 = vsel %vm361_vm0, %v363_v48, %v359_v47 }
 0x167   :  { %v335_v37 = vadd.f32 %v612_v28, %v334_v35 }
 0x169   :  { %v339_v40 = vsel %vm338_vm11, %v612_v28, %v335_v37 }
 0x16a   :  { %v344_v42 = vsel %vm341_vm12, %v343_v38, %v339_v40 }
 0x16b   :  { %v366_v43 = vmul.f32 %v614_v41, %v344_v42 }
 0x16d   :  { %615 = vtanh.f32 %v366_v43 }
 0x173   :  { %v616_v49 = vpop.eup %615 }
 0x174   :  { %v368_v51 = vmul.f32 %v616_v49, %v364_v50 }
 0x176   :  { %441 = vmatmul.f32.vlgmr.msrb.gmra.mxu2 %v368_v51  ;;  %461 = vmatmul.f32.vlgmr.msrb.gmra.mxu3 %v368_v51 }
 0x177   :  { %481 = vmatmul.f32.vlgmr.msrb.gmra.mxu0 %v368_v51 }
 0x1f4   :  { %v482_v62 = vpop.f32.mrf.mxu0 }
 0x1f5   :  { %v483_v0 = vadd.f32 %v482_v62, %v421_v60 }
 0x1f7   :  { %v583_v3 = vmul.f32 -1.442695, %v483_v0 }
 0x1f9   :  { %617 = vpow2.f32 %v583_v3  ;;  %v442_v5 = vpop.f32.mrf.mxu2  ;;  %v462_v19 = vpop.f32.mrf.mxu3 }
 0x1fa   :  { %v443_v6 = vadd.f32 %v442_v5, %v419_v1  ;;  %v463_v22 = vadd.f32 %v462_v19, %v420_v17 }
 0x1fc   :  { %v582_v9 = vmul.f32 -1.442695, %v443_v6 }
 0x1fe   :  { %619 = vpow2.f32 %v582_v9 }
 0x1ff   :  { %v618_v12 = vpop.eup %617 }
 0x200   :  { %v508_v13 = vadd.f32 1.0, %v618_v12 }
 0x202   :  { %621 = vrcp.f32 %v508_v13  ;;  %v520_v37 = vand.u32 2147483648, %v508_v13  ;;  %vm514_vm6 = vweird.f32 %v508_v13  ;;  %v518_v38 = vand.u32 2147483647, %v508_v13 }
 0x204   :  { %v620_v15 = vpop.eup %619  ;;  %v521_v40 = vor.u32 1.1754944e-38, %v520_v37  ;;  %vm519_vm8 = vcmp.eq.f32.partialorder %v518_v38, 8.507059e+37 }
 0x205   :  { %v488_v16 = vadd.f32 1.0, %v620_v15 }
 0x207   :  { %623 = vrcp.f32 %v488_v16  ;;  %v500_v25 = vand.u32 2147483648, %v488_v16  ;;  %v498_v28 = vand.u32 2147483647, %v488_v16  ;;  %vm494_vm2 = vweird.f32 %v488_v16 }
 0x208   :  { %v622_v18 = vpop.eup %621  ;;  %625 = vtanh.f32 %v463_v22 }
 0x209   :  { %v510_v21 = vmul.f32 %v622_v18, %v508_v13  ;;  %v501_v30 = vor.u32 1.1754944e-38, %v500_v25  ;;  %vm499_vm4 = vcmp.eq.f32.partialorder %v498_v28, 8.507059e+37  ;;  %vm515_vm5 = vweird.f32 %v622_v18 }
 0x20a   :  { %vm516_vm7 = vmor %vm514_vm6, %vm515_vm5 }
 0x20b   :  { %v511_v26 = vsub.f32 1.0, %v510_v21 }
 0x20d   :  { %v624_v20 = vpop.eup %623  ;;  %v512_v31 = vmul.f32 %v622_v18, %v511_v26 }
 0x20e   :  { %v490_v23 = vmul.f32 %v624_v20, %v488_v16  ;;  %vm495_vm1 = vweird.f32 %v624_v20  ;;  %v626_v33 = vpop.eup %625 }
 0x20f   :  { %vm496_vm3 = vmor %vm494_vm2, %vm495_vm1  ;;  %v513_v36 = vadd.f32 %v622_v18, %v512_v31 }
 0x210   :  { %v491_v24 = vsub.f32 1.0, %v490_v23 }
 0x211   :  { %v517_v39 = vsel %vm516_vm7, %v622_v18, %v513_v36 }
 0x212   :  { %v492_v27 = vmul.f32 %v624_v20, %v491_v24  ;;  %v522_v42 = vsel %vm519_vm8, %v521_v40, %v517_v39 }
 0x214   :  { %v493_v29 = vadd.f32 %v624_v20, %v492_v27 }
 0x216   :  { %v497_v32 = vsel %vm496_vm3, %v624_v20, %v493_v29 }
 0x217   :  { %v502_v34 = vsel %vm499_vm4, %v501_v30, %v497_v32 }
 0x218   :  { %v524_v35 = vmul.f32 %v626_v33, %v502_v34 }
 0x21a   :  { %627 = vtanh.f32 %v524_v35 }
 0x220   :  { %v628_v41 = vpop.eup %627 }
 0x221   :  { %v526_v43 = vmul.f32 %v628_v41, %v522_v42 }
 0x223   :  { %563 = vmatmul.f32.vlgmr.msrb.gmra.mxu1 %v526_v43 }
 0x2a0   :  { %v564_v45 = vpop.f32.mrf.mxu1 }
 0x2a1   :  { %v565_v46 = vadd.f32 %v592_v44, %v564_v45 }
 0x2a3   :  { %567 = vst [vmem:[%s838_s9] sm:$0xff] %v565_v46 }
 0x2a4   :  { %572 = vsyncpa [#allocation3], 1 }
 0x2a5   :  { %573 = vsyncpa [#allocation5], 1 }
 0x2a6   :  { %574 = vsyncpa [#allocation8], 1 }

</bundles_post_ra>
